<compile_context>
chip_gen: v5e
topology: v5e:2x2
jax: 0.10.0
libtpu: 0.0.40
codegen_flags: <defaults>
</compile_context>

<pallas_src>
import math

import jax
import jax.numpy as jnp
from jax.experimental import pallas as pl
from jax.experimental.pallas import tpu as pltpu

MAX_DIST = 10
EMB_DIM = 16
HIDDEN = EMB_DIM * 2  # 32
GROUP = 8             # nodes packed per output row (8 * 16 feats = 128 lanes)


def _node_label_emb_kernel(x_ref, w1bd_ref, b1_ref, w2bd_ref, b2_ref, o_ref):
    # x_ref:    (TR, 16)   8 nodes per row, 2 raw labels each (any numeric dtype)
    # w1bd_ref: (16, 256)  kron(I_8, W1 * 1/(max_dist+1e-5))  (block diagonal)
    # b1_ref:   (1, 256)   b1 tiled 8x  (lane = 32*node_in_group + k)
    # w2bd_ref: (256, 128) kron(I_8, W2)
    # b2_ref:   (1, 128)   b2 tiled 8x  (lane = 16*node_in_group + e)
    # o_ref:    (TR, 128)  node-packed output tile (free reshape to (8*TR, 16))
    x = x_ref[...].astype(jnp.float32)                                    # (TR, 16)

    # Linear(2 -> 32) for 8 nodes at once: grid-invariant block-diagonal RHS is
    # the stationary MXU operand; per-block activations stream through as LHS.
    h = jnp.dot(x, w1bd_ref[...], preferred_element_type=jnp.float32)     # (TR, 256)
    h = h + b1_ref[...]

    # LeakyReLU(0.1) == max(h, 0.1*h) for slope in (0, 1)
    h = jnp.maximum(h, 0.1 * h)

    # Dropout(p=0.1): identity in eval/inference mode.
    # TODO(synk): training-mode dropout (pltpu.prng_random_bits mask) not implemented.

    # Linear(32 -> 16) for 8 nodes at once; emits the node-packed layout directly.
    out = jnp.dot(h, w2bd_ref[...], preferred_element_type=jnp.float32)   # (TR, 128)
    out = out + b2_ref[...]
    o_ref[...] = out.astype(o_ref.dtype)


def node_label_embedding(node_labels, w1, b1, w2, b2, *, max_dist=MAX_DIST,
                         block_nodes=16384, out_dtype=jnp.float32):
    """node_labels: [N, 2] (any numeric dtype). Returns [N, emb_dim].

    w1: (2, H), b1: (H,), w2: (H, E), b2: (E,)  (x @ W convention, H = 2*E).
    """
    n = node_labels.shape[0]
    hidden = w1.shape[1]
    emb_dim = w2.shape[1]
    g = GROUP
    cols_in = 2 * g          # 16
    cols_h = hidden * g      # 256
    cols_out = emb_dim * g   # 128

    # --- grid sizing: even split, 8-sublane-aligned rows, >=2 steps when possible
    n_grp = pl.cdiv(n, g)                                   # 8-node groups needed
    target_rows = max(block_nodes // g, 8)
    num_blocks = pl.cdiv(n_grp, target_rows)
    if n_grp >= 2 * 8:
        num_blocks = max(num_blocks, 2)    # let ("parallel",) use both v7x cores
    rows = pl.cdiv(pl.cdiv(n_grp, num_blocks), 8) * 8       # rows per grid block
    n_grp_pad = rows * num_blocks
    n_pad = n_grp_pad * g

    # --- input: pad only if ragged (8 B/node), then a FREE contiguous reshape.
    x = node_labels
    if n_pad != n:
        x = jnp.pad(x, ((0, n_pad - n), (0, 0)))
    x_view = x.reshape(n_grp_pad, cols_in)

    # --- weights: fold normalization into W1, expand to block-diagonal form so
    # one matmul handles 8 nodes and produces the node-packed layout directly.
    scale = jnp.float32(1.0 / (max_dist + 1e-5))
    eye_g = jnp.eye(g, dtype=jnp.float32)
    w1bd = jnp.kron(eye_g, w1.astype(jnp.float32) * scale)   # (16, 256)
    w2bd = jnp.kron(eye_g, w2.astype(jnp.float32))           # (256, 128)
    b1t = jnp.tile(b1.astype(jnp.float32), g).reshape(1, cols_h)    # (1, 256)
    b2t = jnp.tile(b2.astype(jnp.float32), g).reshape(1, cols_out)  # (1, 128)

    out_view = pl.pallas_call(
        _node_label_emb_kernel,
        out_shape=jax.ShapeDtypeStruct((n_grp_pad, cols_out), out_dtype),
        grid_spec=pltpu.PrefetchScalarGridSpec(
            num_scalar_prefetch=0,
            grid=(num_blocks,),
            in_specs=[
                pl.BlockSpec((rows, cols_in), lambda i: (i, 0)),      # x tile
                pl.BlockSpec((cols_in, cols_h), lambda i: (0, 0)),    # W1_bd (full)
                pl.BlockSpec((1, cols_h), lambda i: (0, 0)),          # b1 tiled
                pl.BlockSpec((cols_h, cols_out), lambda i: (0, 0)),   # W2_bd (full)
                pl.BlockSpec((1, cols_out), lambda i: (0, 0)),        # b2 tiled
            ],
            out_specs=pl.BlockSpec((rows, cols_out), lambda i: (i, 0)),
        ),
        compiler_params=pltpu.CompilerParams(
            dimension_semantics=("parallel",),   # shards grid across v7x's 2 TCs
            vmem_limit_bytes=32 * 1024 * 1024,
        ),
    )(x_view, w1bd, b1t, w2bd, b2t)

    out = out_view.reshape(n_pad, emb_dim)    # free row-major reshape
    if n_pad != n:
        out = out[:n]                         # only ragged N pays this slice
    return out


def _xavier_uniform(key, fan_in, fan_out):
    # matches torch.nn.init.xavier_uniform_ bound = sqrt(6 / (fan_in + fan_out))
    bound = math.sqrt(6.0 / (fan_in + fan_out))
    return jax.random.uniform(
        key, (fan_in, fan_out), jnp.float32, minval=-bound, maxval=bound
    )


def _reference(node_labels, w1, b1, w2, b2, max_dist=MAX_DIST):
    norm = node_labels.astype(jnp.float32) / (max_dist + 1e-5)
    h = jnp.dot(norm, w1, precision=jax.lax.Precision.HIGHEST) + b1
    h = jnp.where(h >= 0.0, h, 0.1 * h)
    return jnp.dot(h, w2, precision=jax.lax.Precision.HIGHEST) + b2


if __name__ == "__main__":
    key = jax.random.PRNGKey(0)
    k_x, k_w1, k_b1, k_w2, k_b2 = jax.random.split(key, 5)

    # Parameter shapes match the PyTorch module (weights stored (in, out), x @ W).
    # Biases are zero at module init; use small nonzero values here so the
    # bias-tiling path is actually exercised by the self-check.
    w1 = _xavier_uniform(k_w1, 2, HIDDEN)                     # Linear(2, 32)
    b1 = 0.01 * jax.random.normal(k_b1, (HIDDEN,), jnp.float32)
    w2 = _xavier_uniform(k_w2, HIDDEN, EMB_DIM)               # Linear(32, 16)
    b2 = 0.01 * jax.random.normal(k_b2, (EMB_DIM,), jnp.float32)

    # Example node labels: integer distances in [0, max_dist], N x 2.
    # N deliberately NOT a multiple of 8/128 to exercise the ragged-tail path.
    N = 1000
    node_labels = jax.random.randint(k_x, (N, 2), 0, MAX_DIST + 1).astype(jnp.int32)

    out = node_label_embedding(node_labels, w1, b1, w2, b2)
    out = jax.block_until_ready(out)

    ref = _reference(node_labels, w1, b1, w2, b2)
    assert out.shape == (N, EMB_DIM)
    assert jnp.allclose(out, ref, atol=1e-5, rtol=1e-5), float(
        jnp.max(jnp.abs(out - ref))
    )

    print("KERNEL_OK")
</pallas_src>

<mosaic_0001>
module attributes {stable_mosaic.version = 11 : i64} {
  func.func @_node_label_emb_kernel(%arg0: i32, %arg1: memref<64x16xi32, #tpu.memory_space<vmem>>, %arg2: memref<16x256xf32, #tpu.memory_space<vmem>>, %arg3: memref<1x256xf32, #tpu.memory_space<vmem>>, %arg4: memref<256x128xf32, #tpu.memory_space<vmem>>, %arg5: memref<1x128xf32, #tpu.memory_space<vmem>>, %arg6: memref<64x128xf32, #tpu.memory_space<vmem>>) attributes {dimension_semantics = [#tpu.dimension_semantics<parallel>], iteration_bounds = array<i64: 2>, scalar_prefetch = 0 : i64, scratch_operands = 0 : i64, tpu.core_type = #tpu.core_type<tc>, window_params = [{transform_indices = @transform_0, window_bounds = array<i64: 64, 16>}, {pipeline_mode = #tpu.pipeline_mode<synchronous>, transform_indices = @transform_1, window_bounds = array<i64: 16, 256>}, {pipeline_mode = #tpu.pipeline_mode<synchronous>, transform_indices = @transform_2, window_bounds = array<i64: 1, 256>}, {pipeline_mode = #tpu.pipeline_mode<synchronous>, transform_indices = @transform_3, window_bounds = array<i64: 256, 128>}, {pipeline_mode = #tpu.pipeline_mode<synchronous>, transform_indices = @transform_4, window_bounds = array<i64: 1, 128>}, {transform_indices = @transform_5, window_bounds = array<i64: 64, 128>}]} {
    %c0 = arith.constant 0 : index
    %c0_0 = arith.constant 0 : index
    %0 = vector.load %arg1[%c0, %c0_0] : memref<64x16xi32, #tpu.memory_space<vmem>>, vector<64x16xi32>
    %1 = arith.sitofp %0 : vector<64x16xi32> to vector<64x16xf32>
    %c0_1 = arith.constant 0 : index
    %c0_2 = arith.constant 0 : index
    %2 = vector.load %arg2[%c0_1, %c0_2] : memref<16x256xf32, #tpu.memory_space<vmem>>, vector<16x256xf32>
    %cst = arith.constant dense<0.000000e+00> : vector<64x256xf32>
    %3 = tpu.matmul %1, %2, %cst {dimension_numbers = #tpu.dot_dimension_numbers<[1], [0], [0], [1], [0, 0, 1, 1], [], []>} : vector<64x16xf32>, vector<16x256xf32>, vector<64x256xf32> -> vector<64x256xf32>
    %c0_3 = arith.constant 0 : index
    %c0_4 = arith.constant 0 : index
    %4 = vector.load %arg3[%c0_3, %c0_4] : memref<1x256xf32, #tpu.memory_space<vmem>>, vector<1x256xf32>
    %5 = vector.broadcast %4 : vector<1x256xf32> to vector<64x256xf32>
    %6 = arith.addf %3, %5 : vector<64x256xf32>
    %cst_5 = arith.constant 1.000000e-01 : f32
    %7 = vector.broadcast %cst_5 : f32 to vector<64x256xf32>
    %8 = arith.mulf %7, %6 : vector<64x256xf32>
    %9 = arith.maximumf %6, %8 : vector<64x256xf32>
    %c0_6 = arith.constant 0 : index
    %c0_7 = arith.constant 0 : index
    %10 = vector.load %arg4[%c0_6, %c0_7] : memref<256x128xf32, #tpu.memory_space<vmem>>, vector<256x128xf32>
    %cst_8 = arith.constant dense<0.000000e+00> : vector<64x128xf32>
    %11 = tpu.matmul %9, %10, %cst_8 {dimension_numbers = #tpu.dot_dimension_numbers<[1], [0], [0], [1], [0, 0, 1, 1], [], []>} : vector<64x256xf32>, vector<256x128xf32>, vector<64x128xf32> -> vector<64x128xf32>
    %c0_9 = arith.constant 0 : index
    %c0_10 = arith.constant 0 : index
    %12 = vector.load %arg5[%c0_9, %c0_10] : memref<1x128xf32, #tpu.memory_space<vmem>>, vector<1x128xf32>
    %13 = vector.broadcast %12 : vector<1x128xf32> to vector<64x128xf32>
    %14 = arith.addf %11, %13 : vector<64x128xf32>
    %c0_11 = arith.constant 0 : index
    %c0_12 = arith.constant 0 : index
    %15 = vector.load %arg6[%c0_11, %c0_12] : memref<64x128xf32, #tpu.memory_space<vmem>>, vector<64x128xf32>
    tpu.vector_store %arg6[%c0_11, %c0_12], %14 {strides = array<i32>} : memref<64x128xf32, #tpu.memory_space<vmem>>, vector<64x128xf32>,
    return
  }
  func.func @transform_0(%arg0: i32) -> (i32, i32) {
    %c0_i32 = arith.constant 0 : i32
    %c0_i32_0 = arith.constant 0 : i32
    return %arg0, %c0_i32 : i32, i32
  }
  func.func @transform_1(%arg0: i32) -> (i32, i32) {
    %c0_i32 = arith.constant 0 : i32
    %c0_i32_0 = arith.constant 0 : i32
    %c0_i32_1 = arith.constant 0 : i32
    return %c0_i32, %c0_i32_0 : i32, i32
  }
  func.func @transform_2(%arg0: i32) -> (i32, i32) {
    %c0_i32 = arith.constant 0 : i32
    %c0_i32_0 = arith.constant 0 : i32
    %c0_i32_1 = arith.constant 0 : i32
    return %c0_i32, %c0_i32_0 : i32, i32
  }
  func.func @transform_3(%arg0: i32) -> (i32, i32) {
    %c0_i32 = arith.constant 0 : i32
    %c0_i32_0 = arith.constant 0 : i32
    %c0_i32_1 = arith.constant 0 : i32
    return %c0_i32, %c0_i32_0 : i32, i32
  }
  func.func @transform_4(%arg0: i32) -> (i32, i32) {
    %c0_i32 = arith.constant 0 : i32
    %c0_i32_0 = arith.constant 0 : i32
    %c0_i32_1 = arith.constant 0 : i32
    return %c0_i32, %c0_i32_0 : i32, i32
  }
  func.func @transform_5(%arg0: i32) -> (i32, i32) {
    %c0_i32 = arith.constant 0 : i32
    %c0_i32_0 = arith.constant 0 : i32
    return %arg0, %c0_i32 : i32, i32
  }
}

</mosaic_0001>

<bundles_post_ra>
// kernel: tpu_custom_call.1
= control target key start
LH: loop header
LB: loop body
LE: loop exit
PB: predicated region body
PF: predicated region fallthrough
CT: control target
= control target key end

     0   :  { %10 = vsyncpa [#allocation3], 0  ;;  %s1048_s0 = inlined_call_operand.vmem [shape: s32[128,16], index: 0, kind: input, shape index: {}]   ;;  %s1049_s1 = inlined_call_operand.vmem [shape: f32[16,256], index: 1, kind: input, shape index: {}]   ;;  %s1050_s2 = inlined_call_operand.vmem [shape: f32[1,256], index: 2, kind: input, shape index: {}]   ;;  %s1051_s3 = inlined_call_operand.hbm [shape: f32[256,128], index: 3, kind: input, shape index: {}]   ;;  %s1052_s4 = inlined_call_operand.vmem [shape: f32[1,128], index: 4, kind: input, shape index: {}]   ;;  %s1053_s5 = inlined_call_operand.hbm [shape: f32[128,128], index: 5, kind: output, shape index: {}]  }
   0x1   :  { %11 = vsyncpa [#allocation4], 0 }
   0x2   :  { %13 = vsyncpa [#allocation4 + $0x1], 0  ;;  %s875_s18 = smov 0   ;;  %s877_s19 = smov 0  }
   0x3   :  { %s879_s20 = smov 0   ;;  %s881_s21 = smov 0  }
   0x4 LB: > { %s896_s22 = sadd.s32 4294967295, %s838_s21   ;;  %s624_s23 = sadd.s32 4294967294, %s838_s21   ;;  %s838_s21 = sphi %s881_s21, %s1059_s21   ;;  %s834_s20 = sphi %s879_s20, %s1058_s20   ;;  %s830_s19 = sphi %s877_s19, %s1057_s19   ;;  %s826_s18 = sphi %s875_s18, %s1056_s18  }
   0x5   : > { %s900_s24 = sadd.s32 1, %s838_s21   ;;  %s136_s25 = sadd.s32 1, %s834_s20 }
   0x6   : > { %s133_s26 = ssub.s32 %s838_s21, %s900_s24  ;;  %p146_p0 = scmp.ne.s32.totalorder %s834_s20, %s830_s19 }
   0x7   : > { %p134_p1 = scmp.eq.s32.totalorder %s133_s26, 0  ;;  %p147_p2 = scmp.eq.s32.totalorder %s896_s22, 1 }
   0x8   : > { %p152_p3 = scmp.ne.s32.totalorder %s830_s19, %s826_s18  ;;  %p153_p4 = scmp.eq.s32.totalorder %s624_s23, 1 }
   0x9   : > { %s911_s27 = scalar_select %p134_p1, %s834_s20, %s136_s25  }
   0xa   : > { %p913_p5 = por %p147_p2, %p146_p0  ;;  %p917_p6 = por %p153_p4, %p152_p3 }
   0xb   : > { %p625_p7 = scmp.ge.s32.totalorder %s838_s21, 1  ;;  %p160_p8 = scmp.lt.s32.totalorder %s838_s21, 3 }
   0xc   : > { %p701_p9 = scmp.eq.s32.totalorder %s896_s22, 0  ;;  %s177_s7 = sshll.u32 %s1051_s3, 4  ;;  %s178_s7 = int_to_ptr.hbm [resolvable:$true] %s177_s7 }
   0xd   : > { %p161_p10 = pnand %p625_p7, %p160_p8  ;;  %s840_s8 = smov [#allocation2]  }
   0xe   : > { %s179_s9 = sshll.u32 %s840_s8, 4  ;;  %s841_s10 = smov 128   ;;  %s180_s9 = int_to_ptr.vmem [resolvable:$true] %s179_s9 }
   0xf   : > { %p693_p11 = pneg %p161_p10  ;;  %s842_s11 = smov 8  }
  0x10   : > { %207 = sbr.rel (%p161_p10) target bundleno = 359 (0x167), region = 40 }
  0x11   : > { %p694_p12 = pnand %p701_p9, %p693_p11 }
  0x13   : > { %696 = dma.hbm_to_vmem [thread:$0]  (!%p694_p12), %s178_s7, 4096, %s180_s9, [#allocation3], %s841_s10, %s841_s10, %s842_s11  }
  0x15   : > { %817 = dma.done.wait (%p701_p9), [#allocation3], 4096  }
  0x16   : > { %819 = vsyncadd (%p701_p9), [#allocation3], 4294963200  ;;  %s631_s12 = sshll.u32 %s896_s22, 3  ;;  %v261_v0 = vld [vmem:[%s1049_s1 + $0x10] sm:$0xff]  ;;  %v262_v1 = vld [vmem:[%s1049_s1 + $0x18] sm:$0xff]  ;;  %vm269_vm0 = vcmask 130048  }
  0x17   : > { %p237_p13 = scmp.lt.s32.totalorder %s631_s12, 15  ;;  %v259_v2 = vld [vmem:[%s1049_s1] sm:$0xff]  ;;  %308 = vmatpush.msra.mxu0 %v261_v0  ;;  %349 = vmatpush.msra.mxu1 %v262_v1  ;;  %v260_v3 = vld [vmem:[%s1049_s1 + $0x8] sm:$0xff]  ;;  %v423_v12 = vld [vmem:[#allocation2 + $0x78] sm:$0xff]  ;;  %s233_s11 = sand.u32 1, %s830_s19  }
  0x18   : > { %v439_v13 = vld [vmem:[#allocation2 + $0xf8] sm:$0xff]  ;;  %v422_v14 = vld [vmem:[#allocation2 + $0x70] sm:$0xff]  ;;  %v421_v17 = vld [vmem:[#allocation2 + $0x68] sm:$0xff]  ;;  %655 = vmatpush.msra.mxu2 %v423_v12  ;;  %s630_s14 = sshll.u32 %s233_s11, 6  ;;  %s535_s6 = scalar_lea.sflag [#allocation4], %s233_s11 }
  0x19   : > { %s1061_s12 = smov (!%p237_p13, %s631_s12), 15  ;;  %309 = vmatpush.msra.mxu0 %v259_v2  ;;  %350 = vmatpush.msra.mxu1 %v260_v3  ;;  %v438_v16 = vld [vmem:[#allocation2 + $0xf0] sm:$0xff]  ;;  %v437_v18 = vld [vmem:[#allocation2 + $0xe8] sm:$0xff]  ;;  %v420_v20 = vld [vmem:[#allocation2 + $0x60] sm:$0xff]  ;;  %s1004_s15 = scalar_lea.vmem [#allocation5], %s630_s14 }
  0x1a   : > { %s632_s13 = sshll.u32 %s1061_s12, 3  ;;  %671 = vmatpush.msra.mxu3 %v439_v13  ;;  %v436_v21 = vld [vmem:[#allocation2 + $0xe0] sm:$0xff]  ;;  %656 = vmatpush.msra.mxu2 %v422_v14  ;;  %v419_v22 = vld [vmem:[#allocation2 + $0x58] sm:$0xff]  ;;  %v418_v24 = vld [vmem:[#allocation2 + $0x50] sm:$0xff]  ;;  %s547_s26 = sshll.u32 %s1004_s15, 4  ;;  %s548_s26 = int_to_ptr.vmem [resolvable:$true] %s547_s26 }
  0x1b   : > { %s937_s16 = scalar_lea.vmem %s1048_s0, %s632_s13  ;;  %444 = vmatpush.msrb.mxu0 %v423_v12  ;;  %485 = vmatpush.msrb.mxu1 %v439_v13  ;;  %v435_v23 = vld [vmem:[#allocation2 + $0xd8] sm:$0xff]  ;;  %v434_v25 = vld [vmem:[#allocation2 + $0xd0] sm:$0xff]  ;;  %v417_v27 = vld [vmem:[#allocation2 + $0x48] sm:$0xff]  ;;  %s792_s10 = scalar_lea.hbm %s1053_s5, 128 }
  0x1c   : > { %v243_v4 = vld [vmem:[%s937_s16] sm:$0xff]  ;;  %v244_v6 = vld [vmem:[%s937_s16 + $0x8] sm:$0xff]  ;;  %v245_v8 = vld [vmem:[%s937_s16 + $0x10] sm:$0xff]  ;;  %672 = vmatpush.msra.mxu3 %v438_v16  ;;  %657 = vmatpush.msra.mxu2 %v421_v17 }
  0x1d   : > { %v251_v5 = vcvt.s32.f32 %v243_v4  ;;  %v252_v7 = vcvt.s32.f32 %v244_v6  ;;  %v253_v9 = vcvt.s32.f32 %v245_v8  ;;  %v246_v10 = vld [vmem:[%s937_s16 + $0x18] sm:$0xff]  ;;  %v247_v15 = vld [vmem:[%s937_s16 + $0x20] sm:$0xff]  ;;  %445 = vmatpush.msrb.mxu0 %v422_v14  ;;  %486 = vmatpush.msrb.mxu1 %v438_v16  ;;  %v248_v26 = vld [vmem:[%s937_s16 + $0x28] sm:$0xff] }
  0x1e   : > { %v254_v11 = vcvt.s32.f32 %v246_v10  ;;  %v255_v19 = vcvt.s32.f32 %v247_v15  ;;  %673 = vmatpush.msra.mxu3 %v437_v18  ;;  %v433_v28 = vld [vmem:[#allocation2 + $0xc8] sm:$0xff]  ;;  %658 = vmatpush.msra.mxu2 %v420_v20  ;;  %v256_v29 = vcvt.s32.f32 %v248_v26  ;;  %v416_v30 = vld [vmem:[#allocation2 + $0x40] sm:$0xff]  ;;  %v415_v32 = vld [vmem:[#allocation2 + $0x38] sm:$0xff] }
  0x1f   : > { %633 = vmatmul.msk.f32.vlgmr.msra.gmra.mxu0 %vm269_vm0, %v251_v5  ;;  %641 = vmatmul.msk.f32.vlgmr.msra.gmra.mxu1 %vm269_vm0, %v251_v5  ;;  %v432_v31 = vld [vmem:[#allocation2 + $0xc0] sm:$0xff]  ;;  %v431_v33 = vld [vmem:[#allocation2 + $0xb8] sm:$0xff]  ;;  %v414_v34 = vld [vmem:[#allocation2 + $0x30] sm:$0xff] }
  0x20   : > { %446 = vmatpush.msrb.mxu0 %v421_v17  ;;  %487 = vmatpush.msrb.mxu1 %v437_v18  ;;  %v430_v35 = vld [vmem:[#allocation2 + $0xb0] sm:$0xff]  ;;  %v413_v37 = vld [vmem:[#allocation2 + $0x28] sm:$0xff]  ;;  %v412_v40 = vld [vmem:[#allocation2 + $0x20] sm:$0xff] }
  0x21   : > { %674 = vmatpush.msra.mxu3 %v436_v21  ;;  %659 = vmatpush.msra.mxu2 %v419_v22  ;;  %v249_v36 = vld [vmem:[%s937_s16 + $0x30] sm:$0xff]  ;;  %v429_v38 = vld [vmem:[#allocation2 + $0xa8] sm:$0xff]  ;;  %v428_v41 = vld [vmem:[#allocation2 + $0xa0] sm:$0xff] }
  0x22   : > { %447 = vmatpush.msrb.mxu0 %v420_v20  ;;  %488 = vmatpush.msrb.mxu1 %v436_v21  ;;  %v257_v39 = vcvt.s32.f32 %v249_v36  ;;  %v250_v42 = vld [vmem:[%s937_s16 + $0x38] sm:$0xff]  ;;  %v410_v46 = vld [vmem:[#allocation2 + $0x10] sm:$0xff]  ;;  %v409_v48 = vld [vmem:[#allocation2 + $0x8] sm:$0xff]  ;;  %s654_s16 = sshll.u32 %s896_s22, 6 }
  0x23   : > { %675 = vmatpush.msra.mxu3 %v435_v23  ;;  %660 = vmatpush.msra.mxu2 %v418_v24  ;;  %v258_v43 = vcvt.s32.f32 %v250_v42  ;;  %v411_v44 = vld [vmem:[#allocation2 + $0x18] sm:$0xff]  ;;  %v426_v47 = vld [vmem:[#allocation2 + $0x90] sm:$0xff]  ;;  %v425_v49 = vld [vmem:[#allocation2 + $0x88] sm:$0xff]  ;;  %s546_s25 = scalar_lea.hbm %s1053_s5, %s654_s16 }
  0x24   : > { %448 = vmatpush.msrb.mxu0 %v419_v22  ;;  %489 = vmatpush.msrb.mxu1 %v435_v23  ;;  %v427_v45 = vld [vmem:[#allocation2 + $0x98] sm:$0xff]  ;;  %v408_v50 = vld [vmem:[#allocation2] sm:$0xff]  ;;  %s549_s30 = sshll.u32 %s546_s25, 4  ;;  %s550_s30 = int_to_ptr.hbm [resolvable:$true] %s549_s30 }
  0x25   : > { %676 = vmatpush.msra.mxu3 %v434_v25  ;;  %661 = vmatpush.msra.mxu2 %v417_v27  ;;  %v424_v51 = vld [vmem:[#allocation2 + $0x80] sm:$0xff]  ;;  %s786_s7 = sshra.s32 %s550_s30, 4  ;;  %s787_s7 = int_to_ptr.hbm [resolvable:$true] %s786_s7 }
  0x26   : > { %449 = vmatpush.msrb.mxu0 %v418_v24  ;;  %490 = vmatpush.msrb.mxu1 %v434_v25  ;;  %v263_v52 = vld [vmem:[%s1050_s2] sm:$0x3]  ;;  %s788_s22 = scalar_lea.hbm %s787_s7, 64  ;;  %p793_p3 = scmp.lt.s32.totalorder %s787_s7, %s1053_s5 }
  0x27   : > { %634 = vmatmul.msk.f32.gmra.mxu0 %vm269_vm0, %v252_v7  ;;  %642 = vmatmul.msk.f32.gmra.mxu1 %vm269_vm0, %v252_v7  ;;  %v978_v53 = vperm.slane %v263_v52, 0  ;;  %v980_v54 = vperm.slane %v263_v52, 1  ;;  %p789_p0 = scmp.ne.s32.totalorder %s787_s7, %s788_s22  ;;  %p794_p4 = scmp.lt.s32.totalorder %s792_s10, %s788_s22 }
  0x28   : > { %450 = vmatpush.msrb.mxu0 %v417_v27  ;;  %491 = vmatpush.msrb.mxu1 %v433_v28 }
  0x29   : > { %677 = vmatpush.msra.mxu3 %v433_v28  ;;  %662 = vmatpush.msra.mxu2 %v416_v30  ;;  %p790_p1 = pnand %p789_p0, %p913_p5  ;;  %p795_p7 = por %p794_p4, %p793_p3 }
  0x2a   : > { %451 = vmatpush.msrb.mxu0 %v416_v30  ;;  %492 = vmatpush.msrb.mxu1 %v432_v31 }
  0x2b   : > { %678 = vmatpush.msra.mxu3 %v432_v31  ;;  %663 = vmatpush.msra.mxu2 %v415_v32  ;;  %p791_p2 = pneg %p790_p1 }
  0x2c   : > { %452 = vmatpush.msrb.mxu0 %v415_v32  ;;  %493 = vmatpush.msrb.mxu1 %v431_v33 }
  0x2d   : > { %679 = vmatpush.msra.mxu3 %v431_v33  ;;  %664 = vmatpush.msra.mxu2 %v414_v34  ;;  %p796_p8 = pnand %p795_p7, %p791_p2 }
  0x2e   : > { %453 = vmatpush.msrb.mxu0 %v414_v34  ;;  %494 = vmatpush.msrb.mxu1 %v430_v35 }
  0x2f   : > { %635 = vmatmul.msk.f32.gmra.mxu0 %vm269_vm0, %v253_v9  ;;  %643 = vmatmul.msk.f32.gmra.mxu1 %vm269_vm0, %v253_v9 }
  0x30   : > { %454 = vmatpush.msrb.mxu0 %v413_v37  ;;  %495 = vmatpush.msrb.mxu1 %v429_v38 }
  0x31   : > { %680 = vmatpush.msra.mxu3 %v430_v35  ;;  %665 = vmatpush.msra.mxu2 %v413_v37 }
  0x32   : > { %455 = vmatpush.msrb.mxu0 %v412_v40  ;;  %496 = vmatpush.msrb.mxu1 %v428_v41 }
  0x33   : > { %681 = vmatpush.msra.mxu3 %v429_v38  ;;  %666 = vmatpush.msra.mxu2 %v412_v40 }
  0x34   : > { %456 = vmatpush.msrb.mxu0 %v411_v44  ;;  %497 = vmatpush.msrb.mxu1 %v427_v45 }
  0x35   : > { %682 = vmatpush.msra.mxu3 %v428_v41  ;;  %667 = vmatpush.msra.mxu2 %v411_v44 }
  0x36   : > { %457 = vmatpush.msrb.mxu0 %v410_v46  ;;  %498 = vmatpush.msrb.mxu1 %v426_v47 }
  0x37   : > { %636 = vmatmul.msk.f32.gmra.mxu0 %vm269_vm0, %v254_v11  ;;  %644 = vmatmul.msk.f32.gmra.mxu1 %vm269_vm0, %v254_v11 }
  0x38   : > { %683 = vmatpush.msra.mxu3 %v427_v45  ;;  %668 = vmatpush.msra.mxu2 %v410_v46 }
  0x39   : > { %458 = vmatpush.msrb.mxu0 %v409_v48  ;;  %499 = vmatpush.msrb.mxu1 %v425_v49 }
  0x3a   : > { %684 = vmatpush.msra.mxu3 %v426_v47  ;;  %669 = vmatpush.msra.mxu2 %v409_v48 }
  0x3b   : > { %459 = vmatpush.msrb.mxu0 %v408_v50  ;;  %500 = vmatpush.msrb.mxu1 %v424_v51 }
  0x3c   : > { %685 = vmatpush.msra.mxu3 %v425_v49  ;;  %670 = vmatpush.msra.mxu2 %v408_v50 }
  0x3e   : > { %686 = vmatpush.msra.mxu3 %v424_v51 }
  0x3f   : > { %637 = vmatmul.msk.f32.gmra.mxu0 %vm269_vm0, %v255_v19  ;;  %645 = vmatmul.msk.f32.gmra.mxu1 %vm269_vm0, %v255_v19 }
  0x47   : > { %638 = vmatmul.msk.f32.gmra.mxu0 %vm269_vm0, %v256_v29  ;;  %646 = vmatmul.msk.f32.gmra.mxu1 %vm269_vm0, %v256_v29 }
  0x4f   : > { %639 = vmatmul.msk.f32.gmra.mxu0 %vm269_vm0, %v257_v39  ;;  %647 = vmatmul.msk.f32.gmra.mxu1 %vm269_vm0, %v257_v39 }
  0x57   : > { %640 = vmatmul.msk.f32.gmra.mxu0 %vm269_vm0, %v258_v43  ;;  %648 = vmatmul.msk.f32.gmra.mxu1 %vm269_vm0, %v258_v43 }
  0x9c   : > { %v311_v55 = vpop.f32.mrf.mxu0  ;;  %v352_v56 = vpop.f32.mrf.mxu1 }
  0x9d   : > { %v312_v57 = vadd.f32 %v311_v55, %v978_v53  ;;  %v353_v58 = vadd.f32 %v352_v56, %v980_v54 }
  0x9f   : > { %v376_v59 = vmul.f32 0.1, %v312_v57  ;;  %v377_v60 = vmul.f32 0.1, %v353_v58 }
  0xa1   : > { %v392_v61 = vmax.f32 %v312_v57, %v376_v59  ;;  %v393_v62 = vmax.f32 %v353_v58, %v377_v60  ;;  %v741_v57 = vld [vmem:[%s1052_s4] ss:$0 sm:$0xff] }
  0xa3   : > { %460 = vmatmul.f32.vlgmr.msrb.gmra.mxu0 %v392_v61  ;;  %501 = vmatmul.f32.vlgmr.msrb.gmra.mxu1 %v393_v62 }
  0xa4   : > { %v314_v63 = vpop.f32.mrf.mxu0  ;;  %v355_v0 = vpop.f32.mrf.mxu1 }
  0xa5   : > { %v315_v1 = vadd.f32 %v314_v63, %v978_v53  ;;  %v356_v2 = vadd.f32 %v355_v0, %v980_v54 }
  0xa7   : > { %v378_v3 = vmul.f32 0.1, %v315_v1  ;;  %v379_v4 = vmul.f32 0.1, %v356_v2 }
  0xa9   : > { %v394_v5 = vmax.f32 %v315_v1, %v378_v3  ;;  %v395_v6 = vmax.f32 %v356_v2, %v379_v4 }
  0xab   : > { %463 = vmatmul.f32.vlgmr.msra.gmra.mxu2 %v394_v5  ;;  %504 = vmatmul.f32.vlgmr.msra.gmra.mxu3 %v395_v6 }
  0xac   : > { %v317_v7 = vpop.f32.mrf.mxu0  ;;  %v358_v8 = vpop.f32.mrf.mxu1 }
  0xad   : > { %v318_v9 = vadd.f32 %v317_v7, %v978_v53  ;;  %v359_v10 = vadd.f32 %v358_v8, %v980_v54 }
  0xaf   : > { %v380_v11 = vmul.f32 0.1, %v318_v9  ;;  %v381_v12 = vmul.f32 0.1, %v359_v10 }
  0xb1   : > { %v396_v13 = vmax.f32 %v318_v9, %v380_v11  ;;  %v397_v14 = vmax.f32 %v359_v10, %v381_v12 }
  0xb3   : > { %466 = vmatmul.f32.gmra.mxu2 %v396_v13  ;;  %507 = vmatmul.f32.gmra.mxu3 %v397_v14 }
  0xb4   : > { %v320_v15 = vpop.f32.mrf.mxu0  ;;  %v361_v16 = vpop.f32.mrf.mxu1 }
  0xb5   : > { %v321_v17 = vadd.f32 %v320_v15, %v978_v53  ;;  %v362_v18 = vadd.f32 %v361_v16, %v980_v54 }
  0xb7   : > { %v382_v19 = vmul.f32 0.1, %v321_v17  ;;  %v383_v20 = vmul.f32 0.1, %v362_v18 }
  0xb9   : > { %v398_v21 = vmax.f32 %v321_v17, %v382_v19  ;;  %v399_v22 = vmax.f32 %v362_v18, %v383_v20 }
  0xbb   : > { %469 = vmatmul.f32.gmra.mxu2 %v398_v21  ;;  %510 = vmatmul.f32.gmra.mxu3 %v399_v22 }
  0xbc   : > { %v323_v23 = vpop.f32.mrf.mxu0  ;;  %v364_v24 = vpop.f32.mrf.mxu1 }
  0xbd   : > { %v324_v25 = vadd.f32 %v323_v23, %v978_v53  ;;  %v365_v26 = vadd.f32 %v364_v24, %v980_v54 }
  0xbf   : > { %v384_v27 = vmul.f32 0.1, %v324_v25  ;;  %v385_v28 = vmul.f32 0.1, %v365_v26 }
  0xc1   : > { %v400_v29 = vmax.f32 %v324_v25, %v384_v27  ;;  %v401_v30 = vmax.f32 %v365_v26, %v385_v28 }
  0xc3   : > { %472 = vmatmul.f32.gmra.mxu2 %v400_v29  ;;  %513 = vmatmul.f32.gmra.mxu3 %v401_v30 }
  0xc4   : > { %v326_v31 = vpop.f32.mrf.mxu0  ;;  %v367_v32 = vpop.f32.mrf.mxu1 }
  0xc5   : > { %v327_v33 = vadd.f32 %v326_v31, %v978_v53  ;;  %v368_v34 = vadd.f32 %v367_v32, %v980_v54 }
  0xc7   : > { %v386_v35 = vmul.f32 0.1, %v327_v33  ;;  %v387_v36 = vmul.f32 0.1, %v368_v34 }
  0xc9   : > { %v402_v37 = vmax.f32 %v327_v33, %v386_v35  ;;  %v403_v38 = vmax.f32 %v368_v34, %v387_v36 }
  0xcb   : > { %475 = vmatmul.f32.gmra.mxu2 %v402_v37  ;;  %516 = vmatmul.f32.gmra.mxu3 %v403_v38 }
  0xcc   : > { %v329_v39 = vpop.f32.mrf.mxu0  ;;  %v370_v40 = vpop.f32.mrf.mxu1 }
  0xcd   : > { %v330_v41 = vadd.f32 %v329_v39, %v978_v53  ;;  %v371_v42 = vadd.f32 %v370_v40, %v980_v54 }
  0xcf   : > { %v388_v43 = vmul.f32 0.1, %v330_v41  ;;  %v389_v44 = vmul.f32 0.1, %v371_v42 }
  0xd1   : > { %v404_v45 = vmax.f32 %v330_v41, %v388_v43  ;;  %v405_v46 = vmax.f32 %v371_v42, %v389_v44 }
  0xd3   : > { %478 = vmatmul.f32.gmra.mxu2 %v404_v45  ;;  %519 = vmatmul.f32.gmra.mxu3 %v405_v46 }
  0xd4   : > { %v332_v47 = vpop.f32.mrf.mxu0  ;;  %v373_v48 = vpop.f32.mrf.mxu1 }
  0xd5   : > { %v333_v49 = vadd.f32 %v332_v47, %v978_v53  ;;  %v374_v50 = vadd.f32 %v373_v48, %v980_v54 }
  0xd7   : > { %v390_v51 = vmul.f32 0.1, %v333_v49  ;;  %v391_v52 = vmul.f32 0.1, %v374_v50 }
  0xd9   : > { %v406_v55 = vmax.f32 %v333_v49, %v390_v51  ;;  %v407_v56 = vmax.f32 %v374_v50, %v391_v52 }
  0xdb   : > { %481 = vmatmul.f32.gmra.mxu2 %v406_v55  ;;  %522 = vmatmul.f32.gmra.mxu3 %v407_v56 }
 0x120   : > { %v461_v58 = vpop.f32.mrf.mxu0  ;;  %v502_v60 = vpop.f32.mrf.mxu1 }
 0x121   : > { %v462_v59 = vadd.f32 %v741_v57, %v461_v58 }
 0x123   : > { %v503_v61 = vadd.f32 %v502_v60, %v462_v59 }
 0x125   : > { %526 = vst [vmem:[%s1004_s15] sm:$0xff] %v503_v61 }
 0x12e   : > { %v464_v53 = vpop.f32.mrf.mxu2  ;;  %v505_v54 = vpop.f32.mrf.mxu3 }
 0x12f   : > { %v465_v62 = vadd.f32 %v741_v57, %v464_v53 }
 0x131   : > { %v506_v63 = vadd.f32 %v505_v54, %v465_v62 }
 0x133   : > { %527 = vst [vmem:[%s1004_s15 + $0x8] sm:$0xff] %v506_v63 }
 0x136   : > { %v467_v0 = vpop.f32.mrf.mxu2  ;;  %v508_v1 = vpop.f32.mrf.mxu3 }
 0x137   : > { %v468_v2 = vadd.f32 %v741_v57, %v467_v0 }
 0x139   : > { %v509_v3 = vadd.f32 %v508_v1, %v468_v2 }
 0x13b   : > { %528 = vst [vmem:[%s1004_s15 + $0x10] sm:$0xff] %v509_v3 }
 0x13e   : > { %v470_v4 = vpop.f32.mrf.mxu2  ;;  %v511_v5 = vpop.f32.mrf.mxu3 }
 0x13f   : > { %v471_v6 = vadd.f32 %v741_v57, %v470_v4 }
 0x141   : > { %v512_v7 = vadd.f32 %v511_v5, %v471_v6 }
 0x143   : > { %529 = vst [vmem:[%s1004_s15 + $0x18] sm:$0xff] %v512_v7 }
 0x146   : > { %v473_v8 = vpop.f32.mrf.mxu2  ;;  %v514_v9 = vpop.f32.mrf.mxu3 }
 0x147   : > { %v474_v10 = vadd.f32 %v741_v57, %v473_v8 }
 0x149   : > { %v515_v11 = vadd.f32 %v514_v9, %v474_v10 }
 0x14b   : > { %530 = vst [vmem:[%s1004_s15 + $0x20] sm:$0xff] %v515_v11 }
 0x14e   : > { %v476_v12 = vpop.f32.mrf.mxu2  ;;  %v517_v13 = vpop.f32.mrf.mxu3 }
 0x14f   : > { %v477_v14 = vadd.f32 %v741_v57, %v476_v12 }
 0x151   : > { %v518_v15 = vadd.f32 %v517_v13, %v477_v14 }
 0x153   : > { %531 = vst [vmem:[%s1004_s15 + $0x28] sm:$0xff] %v518_v15 }
 0x156   : > { %v479_v16 = vpop.f32.mrf.mxu2  ;;  %v520_v17 = vpop.f32.mrf.mxu3 }
 0x157   : > { %v480_v18 = vadd.f32 %v741_v57, %v479_v16 }
 0x159   : > { %v521_v19 = vadd.f32 %v520_v17, %v480_v18 }
 0x15b   : > { %532 = vst [vmem:[%s1004_s15 + $0x30] sm:$0xff] %v521_v19 }
 0x15e   : > { %v482_v20 = vpop.f32.mrf.mxu2  ;;  %v523_v22 = vpop.f32.mrf.mxu3 }
 0x15f   : > { %v483_v21 = vadd.f32 %v741_v57, %v482_v20 }
 0x161   : > { %v524_v23 = vadd.f32 %v523_v22, %v483_v21 }
 0x163   : > { %533 = vst [vmem:[%s1004_s15 + $0x38] sm:$0xff] %v524_v23 }
 0x164   : > { %799 = shalt.err (!%p796_p8)
}
 0x165   : > { %s843_s11 = smov 128   ;;  %s844_s14 = smov 8  }
 0x166   : > { %691 = dma.vmem_to_hbm [thread:$0]  (%p913_p5), %s548_s26, 1024, %s550_s30, %s535_s6, %s843_s11, %s843_s11, %s844_s14  }
 0x167 PF: > { %p703_p9 = scmp.ge.s32.totalorder %s838_s21, 2  ;;  %s564_s15 = sand.u32 1, %s826_s18  }
 0x168   : > { %s565_s16 = scalar_lea.sflag [#allocation4], %s564_s15 }
 0x169   : > { %p698_p10 = pnand %p703_p9, %p917_p6 }
 0x16b   : > { %p699_p11 = pneg %p698_p10 }
 0x16d   : > { %821 = dma.done.wait (%p699_p11), %s565_s16, 1024  }
 0x16e   : > { %823 = vsyncadd (%p699_p11), %s565_s16, 4294966272  ;;  %p16_p12 = scmp.ge.s32.totalorder %s900_s24, 4   ;;  %s1056_s18 = smov %s830_s19 }
 0x16f   : > { %s1057_s19 = smov %s834_s20  ;;  %s1058_s20 = smov %s911_s27 }
 0x170   : > { %s1059_s21 = smov %s900_s24  ;;  %18 = sbr.rel (!%p16_p12) target bundleno = 4 (0x4), region = 80 }
 0x175   :  { %571 = vsyncpa [#allocation3], 1 }
 0x176   :  { %573 = vsyncpa [#allocation3 + $0x1], 1 }
 0x177   :  { %574 = vsyncpa [#allocation4], 1 }
 0x178   :  { %576 = vsyncpa [#allocation4 + $0x1], 1 }

</bundles_post_ra>
